<compile_context>
chip_gen: v7x
topology: tpu7x:2x2x1
jax: 0.10.0
libtpu: 0.0.40
codegen_flags: <defaults>
</compile_context>

<pallas_src>
import functools
import math

import jax
import jax.numpy as jnp
from jax.experimental import pallas as pl
from jax.experimental.pallas import tpu as pltpu


def _pe_add_kernel(x_ref, pe_ref, o_ref):
    # x_ref / o_ref: (TB, TR, C) VMEM tiles; pe_ref: (TR, C), broadcast over TB.
    o_ref[...] = x_ref[...] + pe_ref[...]


def make_positional_encoding(embed_dim, max_seq_len, dtype=jnp.float32):
    """Deterministic pe buffer matching the PyTorch __init__ (computed in f32)."""
    position = jnp.arange(max_seq_len, dtype=jnp.float32)[:, None]           # (L, 1)
    div_term = jnp.exp(
        jnp.arange(0, embed_dim, 2, dtype=jnp.float32)
        * (-math.log(10000.0) / embed_dim)
    )                                                                         # (D/2,)
    pe = jnp.zeros((max_seq_len, embed_dim), dtype=jnp.float32)
    pe = pe.at[:, 0::2].set(jnp.sin(position * div_term))
    pe = pe.at[:, 1::2].set(jnp.cos(position * div_term))
    return pe.astype(dtype)


def _cdiv(a, b):
    return -(-a // b)


@functools.lru_cache(maxsize=None)
def _plan(B, S, D, itemsize, max_tile_bytes):
    """Pick lane-dense (R, C) per-batch view and (TB, TR) tiles.

    Returns None when plain XLA is the better (or only safe) choice.
    """
    # ---- lane-dense view -----------------------------------------------------
    if D % 128 == 0:
        R, C = S, D
    elif (S * D) % 128 == 0:
        C = 128
        R = (S * D) // C
    else:
        return None  # ragged tiny case -> XLA fused add wins

    # Sub-32-bit dtypes pack along sublanes: clean row granularity is 8*(4/itemsize).
    row_mult = 8 * max(1, 4 // itemsize)
    row_bytes = C * itemsize

    # ---- row tile --------------------------------------------------------------
    if R * row_bytes <= max_tile_bytes:
        TR = R                                   # full extent: always a legal block
    else:
        TR = (max_tile_bytes // row_bytes) // row_mult * row_mult
        if TR < row_mult:
            return None                          # huge-C pathology: fall back to XLA
    n_row_tiles = _cdiv(R, TR)

    # ---- batch tile: merge batch elements when the per-batch tile is tiny ------
    if n_row_tiles == 1:
        TB = max(1, min(B, max_tile_bytes // max(1, TR * row_bytes)))
    else:
        TB = 1
    n_batch_tiles = _cdiv(B, TB)

    # ---- megacore (v7x): ensure >=2 blocks when the data is big enough to care --
    total_bytes = B * R * row_bytes
    if n_row_tiles * n_batch_tiles == 1 and total_bytes >= (2 << 20):
        if B >= 2:
            TB = _cdiv(B, 2)
            n_batch_tiles = _cdiv(B, TB)
        else:
            half = _cdiv(_cdiv(R, 2), row_mult) * row_mult
            if half < R:
                TR = half
                n_row_tiles = _cdiv(R, TR)

    # ---- VMEM budget: double-buffered x/out tiles + double-buffered pe tile -----
    live_bytes = (4 * TB + 2) * TR * row_bytes
    if live_bytes > (40 << 20):                  # would not fit comfortably on v7x
        return None
    vmem_limit = int(min(48 << 20, max(32 << 20, live_bytes + (8 << 20))))

    # pe residency: batch is the inner grid axis with a constant pe block index;
    # keep it "arbitrary" whenever rows are actually tiled so megacore sharding
    # cannot perturb the iteration order that keeps pe VMEM-resident.
    if n_row_tiles > 1:
        semantics = ("parallel", "arbitrary")
    else:
        semantics = ("arbitrary", "parallel")

    return R, C, TR, TB, n_row_tiles, n_batch_tiles, vmem_limit, semantics


class PositionalEncodingPallas:
    """Pallas equivalent of the PyTorch PositionalEncoding module."""

    def __init__(self, embed_dim, max_seq_len, dtype=jnp.float32,
                 max_tile_bytes=4 * 1024 * 1024):
        # 4 MiB tiles already saturate the measured f32-add HBM roofline (~85%)
        # and keep live VMEM well under v7x's 64 MiB/TC (v5e/v6e have 128 MiB).
        self.embed_dim = int(embed_dim)
        self.max_seq_len = int(max_seq_len)
        self.max_tile_bytes = int(max_tile_bytes)
        self.pe = make_positional_encoding(embed_dim, max_seq_len, dtype)
        self._pe_views = {}   # (S, R, C, dtype) -> prepared (R, C) pe view

    def _pe_view(self, S, R, C, dtype):
        # Hoisted/cached: the astype/slice/reshape of pe is a separate un-hidden
        # XLA op; do it once per (S, dtype, view), not once per forward call.
        key = (S, R, C, jnp.dtype(dtype).name)
        v = self._pe_views.get(key)
        if v is None:
            v = self.pe[:S].astype(dtype).reshape(R, C)
            self._pe_views[key] = v
        return v

    def __call__(self, x):
        B, S, D = x.shape
        if D != self.embed_dim:
            raise ValueError(f"x embed_dim {D} != module embed_dim {self.embed_dim}")
        if S > self.max_seq_len:
            raise ValueError(f"seq length {S} exceeds max_seq_len {self.max_seq_len}")

        itemsize = jnp.dtype(x.dtype).itemsize
        plan = _plan(B, S, D, itemsize, self.max_tile_bytes)
        if plan is None:
            # Ragged / pathological shapes: XLA's fused elementwise add wins.
            return x + self.pe[:S].astype(x.dtype)

        R, C, TR, TB, n_row_tiles, n_batch_tiles, vmem_limit, semantics = plan
        pe2 = self._pe_view(S, R, C, x.dtype)
        x2 = x if (R, C) == (S, D) else x.reshape(B, R, C)

        out2 = pl.pallas_call(
            _pe_add_kernel,
            out_shape=jax.ShapeDtypeStruct((B, R, C), x.dtype),
            grid_spec=pltpu.PrefetchScalarGridSpec(
                num_scalar_prefetch=0,
                # Row tiles outer, batch inner: the pe block index is constant
                # across the inner batch loop, so its tile stays VMEM-resident
                # (pe HBM read traffic is S*D, not B*S*D).
                grid=(n_row_tiles, n_batch_tiles),
                in_specs=[
                    pl.BlockSpec((TB, TR, C), lambda r, b: (b, r, 0)),
                    pl.BlockSpec((TR, C), lambda r, b: (r, 0)),
                ],
                out_specs=pl.BlockSpec((TB, TR, C), lambda r, b: (b, r, 0)),
            ),
            compiler_params=pltpu.CompilerParams(
                dimension_semantics=semantics,
                vmem_limit_bytes=vmem_limit,
            ),
            cost_estimate=pl.CostEstimate(
                flops=B * S * D,
                transcendentals=0,
                bytes_accessed=(2 * B * S * D + S * D) * itemsize,
            ),
        )(x2, pe2)

        return out2.reshape(B, S, D)


if __name__ == "__main__":
    key = jax.random.PRNGKey(0)
    k0, k1, k2 = jax.random.split(key, 3)

    # 1) Non-lane-dense D (32): (seq, embed) flattened to 128-wide rows; both
    #    batch elements merged into a single (2, 2, 128) block.
    B, S, D, L = 2, 8, 32, 16
    mod = PositionalEncodingPallas(D, L, dtype=jnp.float32)
    x = jax.random.normal(k0, (B, S, D), dtype=jnp.float32)
    out = jax.block_until_ready(mod(x))
    ref = x + mod.pe[:S]
    assert out.shape == (B, S, D)
    assert jnp.allclose(out, ref, atol=1e-6), "mismatch vs reference (f32 flatten path)"

    # 2) Lane-dense D (multiple of 128), bf16 pe buffer stored in model dtype.
    B2, S2, D2, L2 = 2, 16, 256, 32
    mod2 = PositionalEncodingPallas(D2, L2, dtype=jnp.bfloat16)
    x2 = jax.random.normal(k1, (B2, S2, D2), dtype=jnp.float32).astype(jnp.bfloat16)
    out2 = jax.block_until_ready(mod2(x2))
    ref2 = x2 + mod2.pe[:S2]
    assert out2.shape == (B2, S2, D2)
    assert jnp.allclose(out2.astype(jnp.float32), ref2.astype(jnp.float32),
                        atol=1e-2), "mismatch vs reference (bf16 lane-dense path)"

    # 3) Tiny tile budget to force row tiling with a ragged last tile
    #    (exercises the cdiv grid path at a small shape).
    B3, S3, D3, L3 = 2, 40, 256, 64
    mod3 = PositionalEncodingPallas(D3, L3, dtype=jnp.float32,
                                    max_tile_bytes=16 * 1024)
    x3 = jax.random.normal(k2, (B3, S3, D3), dtype=jnp.float32)
    out3 = jax.block_until_ready(mod3(x3))
    ref3 = x3 + mod3.pe[:S3]
    assert out3.shape == (B3, S3, D3)
    assert jnp.allclose(out3, ref3, atol=1e-6), "mismatch vs reference (tiled ragged path)"

    print("KERNEL_OK")
</pallas_src>

<mosaic_0001>
module attributes {stable_mosaic.version = 11 : i64} {
  func.func @_pe_add_kernel(%arg0: i32, %arg1: i32, %arg2: memref<2x2x128xf32, #tpu.memory_space<vmem>>, %arg3: memref<2x128xf32, #tpu.memory_space<vmem>>, %arg4: memref<2x2x128xf32, #tpu.memory_space<vmem>>) attributes {dimension_semantics = [#tpu.dimension_semantics<arbitrary>, #tpu.dimension_semantics<parallel>], iteration_bounds = array<i64: 1, 1>, scalar_prefetch = 0 : i64, scratch_operands = 0 : i64, tpu.core_type = #tpu.core_type<tc>, window_params = [{transform_indices = @transform_0, window_bounds = array<i64: 2, 2, 128>}, {transform_indices = @transform_1, window_bounds = array<i64: 2, 128>}, {transform_indices = @transform_2, window_bounds = array<i64: 2, 2, 128>}]} {
    %c0 = arith.constant 0 : index
    %c0_0 = arith.constant 0 : index
    %c0_1 = arith.constant 0 : index
    %0 = vector.load %arg2[%c0, %c0_0, %c0_1] : memref<2x2x128xf32, #tpu.memory_space<vmem>>, vector<2x2x128xf32>
    %c0_2 = arith.constant 0 : index
    %c0_3 = arith.constant 0 : index
    %1 = vector.load %arg3[%c0_2, %c0_3] : memref<2x128xf32, #tpu.memory_space<vmem>>, vector<2x128xf32>
    %2 = vector.shape_cast %1 : vector<2x128xf32> to vector<1x2x128xf32>
    %3 = vector.broadcast %2 : vector<1x2x128xf32> to vector<2x2x128xf32>
    %4 = arith.addf %0, %3 : vector<2x2x128xf32>
    %c0_4 = arith.constant 0 : index
    %c0_5 = arith.constant 0 : index
    %c0_6 = arith.constant 0 : index
    %5 = vector.load %arg4[%c0_4, %c0_5, %c0_6] : memref<2x2x128xf32, #tpu.memory_space<vmem>>, vector<2x2x128xf32>
    tpu.vector_store %arg4[%c0_4, %c0_5, %c0_6], %4 {strides = array<i32>} : memref<2x2x128xf32, #tpu.memory_space<vmem>>, vector<2x2x128xf32>,
    return
  }
  func.func @transform_0(%arg0: i32, %arg1: i32) -> (i32, i32, i32) {
    %c0_i32 = arith.constant 0 : i32
    %c0_i32_0 = arith.constant 0 : i32
    return %arg1, %arg0, %c0_i32 : i32, i32, i32
  }
  func.func @transform_1(%arg0: i32, %arg1: i32) -> (i32, i32) {
    %c0_i32 = arith.constant 0 : i32
    %c0_i32_0 = arith.constant 0 : i32
    return %arg0, %c0_i32 : i32, i32
  }
  func.func @transform_2(%arg0: i32, %arg1: i32) -> (i32, i32, i32) {
    %c0_i32 = arith.constant 0 : i32
    %c0_i32_0 = arith.constant 0 : i32
    return %arg1, %arg0, %c0_i32 : i32, i32, i32
  }
}

</mosaic_0001>

<bundles_post_ra>
// kernel: tpu_custom_call.1
= control target key start
LH: loop header
LB: loop body
LE: loop exit
PB: predicated region body
PF: predicated region fallthrough
CT: control target
= control target key end

     0   :  { %7 = vsyncpa [#allocation3], 0  ;;  %s154_s0 = inlined_call_operand.hbm [shape: f32[2,2,128], index: 0, kind: input, shape index: {}]   ;;  %s155_s1 = inlined_call_operand.vmem [shape: f32[2,128], index: 1, kind: input, shape index: {}]   ;;  %s156_s2 = inlined_call_operand.hbm [shape: f32[2,2,128], index: 2, kind: output, shape index: {}]  }
   0x1   :  { %8 = vsyncpa [#allocation4], 0  ;;  %s102_s9 = smov [#allocation2]   ;;  %s54_s13 = scalar_lea.hbm %s154_s0, 64 }
   0x2   :  { %s14_s10 = sshll.u32 %s102_s9, 4  ;;  %p55_p0 = scmp.ne.s32.totalorder %s154_s0, %s54_s13  ;;  %s15_s10 = int_to_ptr.vmem [resolvable:$true] %s14_s10 }
   0x3   :  { %p58_p1 = scmp.lt.u32.totalorder %s54_s13, %s154_s0 }
   0x5   :  { %p60_p2 = pnand %p58_p1, %p55_p0 }
   0x7   :  { %63 = shalt.err (!%p60_p2)
}
   0x8   :  { %s64_s18 = scalar_lea.vmem %s15_s10, 64  ;;  %p69_p4 = scmp.lt.s32.totalorder %s15_s10, %s15_s10 }
   0x9   :  { %p65_p3 = scmp.ne.s32.totalorder %s15_s10, %s64_s18  ;;  %p70_p5 = scmp.lt.s32.totalorder %s64_s18, %s64_s18 }
   0xb   :  { %p71_p6 = por %p70_p5, %p69_p4 }
   0xd   :  { %p72_p7 = pnand %p71_p6, %p65_p3 }
   0xf   :  { %75 = shalt.err (!%p72_p7)
}
  0x10   :  { %s103_s19 = smov 32   ;;  %s104_s20 = smov 2  }
  0x11   :  { %20 = dma.hbm_to_vmem [thread:$0]  %s154_s0, 64, %s15_s10, [#allocation3], %s103_s19, %s103_s19, %s104_s20  }
  0x12   :  { %98 = dma.done.wait [#allocation3], 64  }
  0x13   :  { %99 = vsyncadd [#allocation3], 4294967232  ;;  %s105_s23 = smov [#allocation5]   ;;  %v26_v0 = vld [vmem:[#allocation2] sm:$0x3] }
  0x14   :  { %s38_s24 = sshll.u32 %s105_s23, 4  ;;  %v28_v1 = vld [vmem:[%s155_s1] sm:$0x3]  ;;  %v27_v2 = vld [vmem:[#allocation2 + $0x2] sm:$0x3]  ;;  %s39_s24 = int_to_ptr.vmem [resolvable:$true] %s38_s24 }
  0x15   :  { %v29_v3 = vadd.f32 %v28_v1, %v26_v0  ;;  %v30_v4 = vadd.f32 %v28_v1, %v27_v2  ;;  %s76_s27 = scalar_lea.vmem %s39_s24, 64  ;;  %p81_p9 = scmp.lt.s32.totalorder %s39_s24, %s39_s24 }
  0x16   :  { %p77_p8 = scmp.ne.s32.totalorder %s39_s24, %s76_s27  ;;  %p82_p10 = scmp.lt.s32.totalorder %s76_s27, %s76_s27 }
  0x17   :  { %31 = vst [vmem:[#allocation5] sm:$0x3] %v29_v3  ;;  %32 = vst [vmem:[#allocation5 + $0x2] sm:$0x3] %v30_v4 }
  0x18   :  { %p83_p11 = por %p82_p10, %p81_p9 }
  0x1a   :  { %p84_p12 = pnand %p83_p11, %p77_p8 }
  0x1c   :  { %87 = shalt.err (!%p84_p12)
}
  0x1d   :  { %s88_s29 = scalar_lea.hbm %s156_s2, 64 }
  0x1e   :  { %p89_p13 = scmp.ne.s32.totalorder %s156_s2, %s88_s29  ;;  %p92_p0 = scmp.lt.u32.totalorder %s88_s29, %s156_s2 }
  0x20   :  { %p94_p1 = pnand %p92_p0, %p89_p13 }
  0x22   :  { %97 = shalt.err (!%p94_p1)
}
  0x23   :  { %44 = dma.vmem_to_hbm [thread:$0]  %s39_s24, 64, %s156_s2, [#allocation4], %s103_s19, %s103_s19, %s104_s20  }
  0x24   :  { %100 = dma.done.wait [#allocation4], 64  }
  0x25   :  { %101 = vsyncadd [#allocation4], 4294967232 }
  0x26   :  { %48 = vsyncpa [#allocation3], 1 }
  0x27   :  { %49 = vsyncpa [#allocation4], 1 }

</bundles_post_ra>
